<compile_context>
chip_gen: v5e
topology: v5e:2x2
jax: 0.10.0
libtpu: 0.0.40
codegen_flags: <defaults>
</compile_context>

<pallas_src>
import jax
import jax.numpy as jnp
from jax.experimental import pallas as pl
from jax.experimental.pallas import tpu as pltpu

EPS = 1e-5  # PyTorch InstanceNorm2d default (affine=False)


def _make_kernel(H, W, C):
    HW = H * W

    def kernel(x_ref, w1_ref, w2_ref, coord_ref, out_ref, stk_ref):
        # x_ref    : (1, C, HW)   one image; channels on sublanes, spatial on lanes
        # w*_ref   : (C, 9*C)     flattened conv weights, col = (3*ky+kx)*C + ci
        # coord_ref: (2, HW)      int32 [row h ; col w] for each flattened pixel
        # out_ref  : (1, C, HW)
        # stk_ref  : (9*C, HW)    VMEM scratch holding the 9 stacked shifted taps
        x = x_ref[0]                        # (C, HW)
        hh = coord_ref[0:1, :]              # (1, HW)
        ww = coord_ref[1:2, :]              # (1, HW)

        # boundary masks (computed once, reused by both convs)
        top = hh >= 1
        bot = hh <= H - 2
        left = ww >= 1
        right = ww <= W - 2

        def _combine(a, b):
            if a is None:
                return b
            if b is None:
                return a
            return jnp.logical_and(a, b)

        row_mask = {-1: top, 0: None, 1: bot}
        col_mask = {-1: left, 0: None, 1: right}
        tap_mask = {(dy, dx): _combine(row_mask[dy], col_mask[dx])
                    for dy in (-1, 0, 1) for dx in (-1, 0, 1)}

        def stage_taps(a):
            # Write the 9 shifted-and-masked copies of `a` into stk_ref so the
            # conv becomes one K = 9*C matmul.
            for ky in range(3):
                for kx in range(3):
                    dy, dx = ky - 1, kx - 1
                    d = dy * W + dx          # flat-lane shift of this tap
                    if d == 0:
                        shifted = a
                    else:
                        # shifted[p] = a[p + d]; wrapped lanes get masked below
                        shifted = pltpu.roll(a, shift=(-d) % HW, axis=1)
                    mask = tap_mask[(dy, dx)]
                    if mask is not None:
                        shifted = jnp.where(mask, shifted, 0.0)
                    t = 3 * ky + kx
                    stk_ref[t * C:(t + 1) * C, :] = shifted

        def inorm(y):
            # single-pass InstanceNorm over the spatial (lane) axis, per channel
            s1 = jnp.sum(y, axis=1, keepdims=True)
            s2 = jnp.sum(y * y, axis=1, keepdims=True)
            mean = s1 * (1.0 / HW)
            var = s2 * (1.0 / HW) - mean * mean       # biased variance (PyTorch)
            return (y - mean) * jax.lax.rsqrt(var + EPS)

        # conv1 (single K=9C matmul) -> InstanceNorm -> ReLU
        stage_taps(x)
        h1 = jnp.dot(w1_ref[...], stk_ref[...],
                     preferred_element_type=jnp.float32)
        h1 = jnp.maximum(inorm(h1), 0.0)

        # conv2 -> InstanceNorm
        stage_taps(h1)
        h2 = jnp.dot(w2_ref[...], stk_ref[...],
                     preferred_element_type=jnp.float32)
        h2 = inorm(h2)

        # residual add, lane-dense store
        out_ref[0] = x + h2

    return kernel


def residual_block(x_nchw, w1, b1, w2, b2):
    """x_nchw: (N, C, H, W); w*: (C, C, 3, 3) PyTorch layout; b*: (C,)."""
    N, C, H, W = x_nchw.shape
    HW = H * W

    # free reshape; no transpose / pad passes over HBM
    x2 = x_nchw.reshape(N, C, HW).astype(jnp.float32)

    # (C_out, C_in, 3, 3) -> (C_out, 3, 3, C_in) -> (C_out, 9*C_in);
    # column index = (3*ky + kx)*C_in + ci, matching the in-kernel tap order.
    w1f = jnp.transpose(w1, (0, 2, 3, 1)).reshape(C, 9 * C).astype(jnp.float32)
    w2f = jnp.transpose(w2, (0, 2, 3, 1)).reshape(C, 9 * C).astype(jnp.float32)

    # b1/b2 intentionally unused: bias before affine-free InstanceNorm is
    # cancelled exactly by the mean subtraction (saves two DMAs + broadcasts).
    del b1, b2

    # per-pixel (row, col) coordinates for the in-kernel boundary masks
    pix = jnp.arange(HW, dtype=jnp.int32)
    coords = jnp.stack([pix // W, pix % W], axis=0)            # (2, HW)

    kernel = _make_kernel(H, W, C)
    out = pl.pallas_call(
        kernel,
        out_shape=jax.ShapeDtypeStruct((N, C, HW), jnp.float32),
        grid_spec=pltpu.PrefetchScalarGridSpec(
            num_scalar_prefetch=0,
            grid=(N,),
            in_specs=[
                pl.BlockSpec((1, C, HW), lambda n: (n, 0, 0)),
                pl.BlockSpec((C, 9 * C), lambda n: (0, 0)),
                pl.BlockSpec((C, 9 * C), lambda n: (0, 0)),
                pl.BlockSpec((2, HW), lambda n: (0, 0)),
            ],
            out_specs=pl.BlockSpec((1, C, HW), lambda n: (n, 0, 0)),
            scratch_shapes=[pltpu.VMEM((9 * C, HW), jnp.float32)],
        ),
        compiler_params=pltpu.CompilerParams(
            dimension_semantics=("parallel",),
        ),
    )(x2, w1f, w2f, coords)

    return out.reshape(N, C, H, W)


def _reference(x_nchw, w1, b1, w2, b2):
    """Pure-JAX reference mirroring the PyTorch module."""
    def conv(x, w, b):
        y = jax.lax.conv_general_dilated(
            x, w, window_strides=(1, 1), padding=((1, 1), (1, 1)),
            dimension_numbers=("NCHW", "OIHW", "NCHW"))
        return y + b[None, :, None, None]

    def inorm(x):
        m = jnp.mean(x, axis=(2, 3), keepdims=True)
        v = jnp.mean((x - m) ** 2, axis=(2, 3), keepdims=True)
        return (x - m) / jnp.sqrt(v + EPS)

    h = jnp.maximum(inorm(conv(x_nchw, w1, b1)), 0.0)
    h = inorm(conv(h, w2, b2))
    return x_nchw + h


if __name__ == "__main__":
    N, C, H, W = 2, 4, 16, 16
    key = jax.random.PRNGKey(0)
    kx, kw1, kb1, kw2, kb2 = jax.random.split(key, 5)

    x = jax.random.normal(kx, (N, C, H, W), jnp.float32)
    # deterministic synthetic weights (Conv2d(features, features, 3) shapes)
    bound = 1.0 / (C * 9) ** 0.5
    w1 = jax.random.uniform(kw1, (C, C, 3, 3), jnp.float32, -bound, bound)
    b1 = jax.random.uniform(kb1, (C,), jnp.float32, -bound, bound)
    w2 = jax.random.uniform(kw2, (C, C, 3, 3), jnp.float32, -bound, bound)
    b2 = jax.random.uniform(kb2, (C,), jnp.float32, -bound, bound)

    out = residual_block(x, w1, b1, w2, b2)
    out = jax.block_until_ready(out)

    ref = _reference(x, w1, b1, w2, b2)
    assert out.shape == (N, C, H, W)
    assert jnp.allclose(out, ref, rtol=1e-3, atol=1e-3)

    print("KERNEL_OK")
</pallas_src>

<mosaic_0001>
module attributes {stable_mosaic.version = 11 : i64} {
  func.func @kernel(%arg0: i32, %arg1: memref<1x4x256xf32, #tpu.memory_space<vmem>>, %arg2: memref<4x36xf32, #tpu.memory_space<vmem>>, %arg3: memref<4x36xf32, #tpu.memory_space<vmem>>, %arg4: memref<2x256xi32, #tpu.memory_space<vmem>>, %arg5: memref<1x4x256xf32, #tpu.memory_space<vmem>>, %arg6: memref<36x256xf32, #tpu.memory_space<vmem>>) attributes {dimension_semantics = [#tpu.dimension_semantics<parallel>], iteration_bounds = array<i64: 2>, scalar_prefetch = 0 : i64, scratch_operands = 1 : i64, tpu.core_type = #tpu.core_type<tc>, window_params = [{transform_indices = @transform_0, window_bounds = array<i64: 1, 4, 256>}, {pipeline_mode = #tpu.pipeline_mode<synchronous>, transform_indices = @transform_1, window_bounds = array<i64: 4, 36>}, {pipeline_mode = #tpu.pipeline_mode<synchronous>, transform_indices = @transform_2, window_bounds = array<i64: 4, 36>}, {pipeline_mode = #tpu.pipeline_mode<synchronous>, transform_indices = @transform_3, window_bounds = array<i64: 2, 256>}, {transform_indices = @transform_4, window_bounds = array<i64: 1, 4, 256>}]} {
    %c0 = arith.constant 0 : index
    %c0_0 = arith.constant 0 : index
    %c0_1 = arith.constant 0 : index
    %0 = vector.load %arg1[%c0, %c0_0, %c0_1] : memref<1x4x256xf32, #tpu.memory_space<vmem>>, vector<1x4x256xf32>
    %1 = vector.shape_cast %0 : vector<1x4x256xf32> to vector<4x256xf32>
    %c0_2 = arith.constant 0 : index
    %c0_3 = arith.constant 0 : index
    %2 = vector.load %arg4[%c0_2, %c0_3] : memref<2x256xi32, #tpu.memory_space<vmem>>, vector<1x256xi32>
    %c1 = arith.constant 1 : index
    %c0_4 = arith.constant 0 : index
    %3 = vector.load %arg4[%c1, %c0_4] : memref<2x256xi32, #tpu.memory_space<vmem>>, vector<1x256xi32>
    %c1_i32 = arith.constant 1 : i32
    %4 = vector.broadcast %c1_i32 : i32 to vector<1x256xi32>
    %5 = arith.cmpi sge, %2, %4 : vector<1x256xi32>
    %c14_i32 = arith.constant 14 : i32
    %6 = vector.broadcast %c14_i32 : i32 to vector<1x256xi32>
    %7 = arith.cmpi sle, %2, %6 : vector<1x256xi32>
    %c1_i32_5 = arith.constant 1 : i32
    %8 = vector.broadcast %c1_i32_5 : i32 to vector<1x256xi32>
    %9 = arith.cmpi sge, %3, %8 : vector<1x256xi32>
    %c14_i32_6 = arith.constant 14 : i32
    %10 = vector.broadcast %c14_i32_6 : i32 to vector<1x256xi32>
    %11 = arith.cmpi sle, %3, %10 : vector<1x256xi32>
    %12 = arith.andi %5, %9 : vector<1x256xi1>
    %13 = arith.andi %5, %11 : vector<1x256xi1>
    %14 = arith.andi %7, %9 : vector<1x256xi1>
    %15 = arith.andi %7, %11 : vector<1x256xi1>
    %c17_i32 = arith.constant 17 : i32
    %16 = tpu.dynamic_rotate %1 by %c17_i32 dim 1 : vector<4x256xf32>, i32 -> vector<4x256xf32>
    %cst = arith.constant 0.000000e+00 : f32
    %17 = vector.shape_cast %12 : vector<1x256xi1> to vector<1x256xi1>
    %18 = vector.broadcast %17 : vector<1x256xi1> to vector<4x256xi1>
    %19 = vector.broadcast %cst : f32 to vector<4x256xf32>
    %20 = arith.select %18, %16, %19 : vector<4x256xi1>, vector<4x256xf32>
    %c0_7 = arith.constant 0 : index
    %c0_8 = arith.constant 0 : index
    %21 = vector.load %arg6[%c0_7, %c0_8] : memref<36x256xf32, #tpu.memory_space<vmem>>, vector<4x256xf32>
    tpu.vector_store %arg6[%c0_7, %c0_8], %20 {strides = array<i32>} : memref<36x256xf32, #tpu.memory_space<vmem>>, vector<4x256xf32>,
    %c16_i32 = arith.constant 16 : i32
    %22 = tpu.dynamic_rotate %1 by %c16_i32 dim 1 : vector<4x256xf32>, i32 -> vector<4x256xf32>
    %cst_9 = arith.constant 0.000000e+00 : f32
    %23 = vector.shape_cast %5 : vector<1x256xi1> to vector<1x256xi1>
    %24 = vector.broadcast %23 : vector<1x256xi1> to vector<4x256xi1>
    %25 = vector.broadcast %cst_9 : f32 to vector<4x256xf32>
    %26 = arith.select %24, %22, %25 : vector<4x256xi1>, vector<4x256xf32>
    %c4 = arith.constant 4 : index
    %c0_10 = arith.constant 0 : index
    %27 = vector.load %arg6[%c4, %c0_10] : memref<36x256xf32, #tpu.memory_space<vmem>>, vector<4x256xf32>
    tpu.vector_store %arg6[%c4, %c0_10], %26 {strides = array<i32>} : memref<36x256xf32, #tpu.memory_space<vmem>>, vector<4x256xf32>,
    %c15_i32 = arith.constant 15 : i32
    %28 = tpu.dynamic_rotate %1 by %c15_i32 dim 1 : vector<4x256xf32>, i32 -> vector<4x256xf32>
    %cst_11 = arith.constant 0.000000e+00 : f32
    %29 = vector.shape_cast %13 : vector<1x256xi1> to vector<1x256xi1>
    %30 = vector.broadcast %29 : vector<1x256xi1> to vector<4x256xi1>
    %31 = vector.broadcast %cst_11 : f32 to vector<4x256xf32>
    %32 = arith.select %30, %28, %31 : vector<4x256xi1>, vector<4x256xf32>
    %c8 = arith.constant 8 : index
    %c0_12 = arith.constant 0 : index
    %33 = vector.load %arg6[%c8, %c0_12] : memref<36x256xf32, #tpu.memory_space<vmem>>, vector<4x256xf32>
    tpu.vector_store %arg6[%c8, %c0_12], %32 {strides = array<i32>} : memref<36x256xf32, #tpu.memory_space<vmem>>, vector<4x256xf32>,
    %c1_i32_13 = arith.constant 1 : i32
    %34 = tpu.dynamic_rotate %1 by %c1_i32_13 dim 1 : vector<4x256xf32>, i32 -> vector<4x256xf32>
    %cst_14 = arith.constant 0.000000e+00 : f32
    %35 = vector.shape_cast %9 : vector<1x256xi1> to vector<1x256xi1>
    %36 = vector.broadcast %35 : vector<1x256xi1> to vector<4x256xi1>
    %37 = vector.broadcast %cst_14 : f32 to vector<4x256xf32>
    %38 = arith.select %36, %34, %37 : vector<4x256xi1>, vector<4x256xf32>
    %c12 = arith.constant 12 : index
    %c0_15 = arith.constant 0 : index
    %39 = vector.load %arg6[%c12, %c0_15] : memref<36x256xf32, #tpu.memory_space<vmem>>, vector<4x256xf32>
    tpu.vector_store %arg6[%c12, %c0_15], %38 {strides = array<i32>} : memref<36x256xf32, #tpu.memory_space<vmem>>, vector<4x256xf32>,
    %c16 = arith.constant 16 : index
    %c0_16 = arith.constant 0 : index
    %40 = vector.load %arg6[%c16, %c0_16] : memref<36x256xf32, #tpu.memory_space<vmem>>, vector<4x256xf32>
    tpu.vector_store %arg6[%c16, %c0_16], %1 {strides = array<i32>} : memref<36x256xf32, #tpu.memory_space<vmem>>, vector<4x256xf32>,
    %c255_i32 = arith.constant 255 : i32
    %41 = tpu.dynamic_rotate %1 by %c255_i32 dim 1 : vector<4x256xf32>, i32 -> vector<4x256xf32>
    %cst_17 = arith.constant 0.000000e+00 : f32
    %42 = vector.shape_cast %11 : vector<1x256xi1> to vector<1x256xi1>
    %43 = vector.broadcast %42 : vector<1x256xi1> to vector<4x256xi1>
    %44 = vector.broadcast %cst_17 : f32 to vector<4x256xf32>
    %45 = arith.select %43, %41, %44 : vector<4x256xi1>, vector<4x256xf32>
    %c20 = arith.constant 20 : index
    %c0_18 = arith.constant 0 : index
    %46 = vector.load %arg6[%c20, %c0_18] : memref<36x256xf32, #tpu.memory_space<vmem>>, vector<4x256xf32>
    tpu.vector_store %arg6[%c20, %c0_18], %45 {strides = array<i32>} : memref<36x256xf32, #tpu.memory_space<vmem>>, vector<4x256xf32>,
    %c241_i32 = arith.constant 241 : i32
    %47 = tpu.dynamic_rotate %1 by %c241_i32 dim 1 : vector<4x256xf32>, i32 -> vector<4x256xf32>
    %cst_19 = arith.constant 0.000000e+00 : f32
    %48 = vector.shape_cast %14 : vector<1x256xi1> to vector<1x256xi1>
    %49 = vector.broadcast %48 : vector<1x256xi1> to vector<4x256xi1>
    %50 = vector.broadcast %cst_19 : f32 to vector<4x256xf32>
    %51 = arith.select %49, %47, %50 : vector<4x256xi1>, vector<4x256xf32>
    %c24 = arith.constant 24 : index
    %c0_20 = arith.constant 0 : index
    %52 = vector.load %arg6[%c24, %c0_20] : memref<36x256xf32, #tpu.memory_space<vmem>>, vector<4x256xf32>
    tpu.vector_store %arg6[%c24, %c0_20], %51 {strides = array<i32>} : memref<36x256xf32, #tpu.memory_space<vmem>>, vector<4x256xf32>,
    %c240_i32 = arith.constant 240 : i32
    %53 = tpu.dynamic_rotate %1 by %c240_i32 dim 1 : vector<4x256xf32>, i32 -> vector<4x256xf32>
    %cst_21 = arith.constant 0.000000e+00 : f32
    %54 = vector.shape_cast %7 : vector<1x256xi1> to vector<1x256xi1>
    %55 = vector.broadcast %54 : vector<1x256xi1> to vector<4x256xi1>
    %56 = vector.broadcast %cst_21 : f32 to vector<4x256xf32>
    %57 = arith.select %55, %53, %56 : vector<4x256xi1>, vector<4x256xf32>
    %c28 = arith.constant 28 : index
    %c0_22 = arith.constant 0 : index
    %58 = vector.load %arg6[%c28, %c0_22] : memref<36x256xf32, #tpu.memory_space<vmem>>, vector<4x256xf32>
    tpu.vector_store %arg6[%c28, %c0_22], %57 {strides = array<i32>} : memref<36x256xf32, #tpu.memory_space<vmem>>, vector<4x256xf32>,
    %c239_i32 = arith.constant 239 : i32
    %59 = tpu.dynamic_rotate %1 by %c239_i32 dim 1 : vector<4x256xf32>, i32 -> vector<4x256xf32>
    %cst_23 = arith.constant 0.000000e+00 : f32
    %60 = vector.shape_cast %15 : vector<1x256xi1> to vector<1x256xi1>
    %61 = vector.broadcast %60 : vector<1x256xi1> to vector<4x256xi1>
    %62 = vector.broadcast %cst_23 : f32 to vector<4x256xf32>
    %63 = arith.select %61, %59, %62 : vector<4x256xi1>, vector<4x256xf32>
    %c32 = arith.constant 32 : index
    %c0_24 = arith.constant 0 : index
    %64 = vector.load %arg6[%c32, %c0_24] : memref<36x256xf32, #tpu.memory_space<vmem>>, vector<4x256xf32>
    tpu.vector_store %arg6[%c32, %c0_24], %63 {strides = array<i32>} : memref<36x256xf32, #tpu.memory_space<vmem>>, vector<4x256xf32>,
    %c0_25 = arith.constant 0 : index
    %c0_26 = arith.constant 0 : index
    %65 = vector.load %arg2[%c0_25, %c0_26] : memref<4x36xf32, #tpu.memory_space<vmem>>, vector<4x36xf32>
    %c0_27 = arith.constant 0 : index
    %c0_28 = arith.constant 0 : index
    %66 = vector.load %arg6[%c0_27, %c0_28] : memref<36x256xf32, #tpu.memory_space<vmem>>, vector<36x256xf32>
    %cst_29 = arith.constant dense<0.000000e+00> : vector<4x256xf32>
    %67 = tpu.matmul %65, %66, %cst_29 {dimension_numbers = #tpu.dot_dimension_numbers<[1], [0], [0], [1], [0, 0, 1, 1], [], []>} : vector<4x36xf32>, vector<36x256xf32>, vector<4x256xf32> -> vector<4x256xf32>
    %cst_30 = arith.constant dense<0.000000e+00> : vector<4xf32>
    %68 = vector.multi_reduction <add>, %67, %cst_30 [1] : vector<4x256xf32> to vector<4xf32>
    %69 = vector.shape_cast %68 : vector<4xf32> to vector<4x1xf32>
    %70 = arith.mulf %67, %67 : vector<4x256xf32>
    %cst_31 = arith.constant dense<0.000000e+00> : vector<4xf32>
    %71 = vector.multi_reduction <add>, %70, %cst_31 [1] : vector<4x256xf32> to vector<4xf32>
    %72 = vector.shape_cast %71 : vector<4xf32> to vector<4x1xf32>
    %cst_32 = arith.constant 3.906250e-03 : f32
    %73 = vector.broadcast %cst_32 : f32 to vector<4x1xf32>
    %74 = arith.mulf %69, %73 : vector<4x1xf32>
    %cst_33 = arith.constant 3.906250e-03 : f32
    %75 = vector.broadcast %cst_33 : f32 to vector<4x1xf32>
    %76 = arith.mulf %72, %75 : vector<4x1xf32>
    %77 = arith.mulf %74, %74 : vector<4x1xf32>
    %78 = arith.subf %76, %77 : vector<4x1xf32>
    %79 = vector.broadcast %74 : vector<4x1xf32> to vector<4x256xf32>
    %80 = arith.subf %67, %79 : vector<4x256xf32>
    %cst_34 = arith.constant 9.99999974E-6 : f32
    %81 = vector.broadcast %cst_34 : f32 to vector<4x1xf32>
    %82 = arith.addf %78, %81 : vector<4x1xf32>
    %83 = math.rsqrt %82 : vector<4x1xf32>
    %84 = vector.broadcast %83 : vector<4x1xf32> to vector<4x256xf32>
    %85 = arith.mulf %80, %84 : vector<4x256xf32>
    %cst_35 = arith.constant 0.000000e+00 : f32
    %86 = vector.broadcast %cst_35 : f32 to vector<4x256xf32>
    %87 = arith.maximumf %85, %86 : vector<4x256xf32>
    %c17_i32_36 = arith.constant 17 : i32
    %88 = tpu.dynamic_rotate %87 by %c17_i32_36 dim 1 : vector<4x256xf32>, i32 -> vector<4x256xf32>
    %cst_37 = arith.constant 0.000000e+00 : f32
    %89 = vector.shape_cast %12 : vector<1x256xi1> to vector<1x256xi1>
    %90 = vector.broadcast %89 : vector<1x256xi1> to vector<4x256xi1>
    %91 = vector.broadcast %cst_37 : f32 to vector<4x256xf32>
    %92 = arith.select %90, %88, %91 : vector<4x256xi1>, vector<4x256xf32>
    %c0_38 = arith.constant 0 : index
    %c0_39 = arith.constant 0 : index
    %93 = vector.load %arg6[%c0_38, %c0_39] : memref<36x256xf32, #tpu.memory_space<vmem>>, vector<4x256xf32>
    tpu.vector_store %arg6[%c0_38, %c0_39], %92 {strides = array<i32>} : memref<36x256xf32, #tpu.memory_space<vmem>>, vector<4x256xf32>,
    %c16_i32_40 = arith.constant 16 : i32
    %94 = tpu.dynamic_rotate %87 by %c16_i32_40 dim 1 : vector<4x256xf32>, i32 -> vector<4x256xf32>
    %cst_41 = arith.constant 0.000000e+00 : f32
    %95 = vector.shape_cast %5 : vector<1x256xi1> to vector<1x256xi1>
    %96 = vector.broadcast %95 : vector<1x256xi1> to vector<4x256xi1>
    %97 = vector.broadcast %cst_41 : f32 to vector<4x256xf32>
    %98 = arith.select %96, %94, %97 : vector<4x256xi1>, vector<4x256xf32>
    %c4_42 = arith.constant 4 : index
    %c0_43 = arith.constant 0 : index
    %99 = vector.load %arg6[%c4_42, %c0_43] : memref<36x256xf32, #tpu.memory_space<vmem>>, vector<4x256xf32>
    tpu.vector_store %arg6[%c4_42, %c0_43], %98 {strides = array<i32>} : memref<36x256xf32, #tpu.memory_space<vmem>>, vector<4x256xf32>,
    %c15_i32_44 = arith.constant 15 : i32
    %100 = tpu.dynamic_rotate %87 by %c15_i32_44 dim 1 : vector<4x256xf32>, i32 -> vector<4x256xf32>
    %cst_45 = arith.constant 0.000000e+00 : f32
    %101 = vector.shape_cast %13 : vector<1x256xi1> to vector<1x256xi1>
    %102 = vector.broadcast %101 : vector<1x256xi1> to vector<4x256xi1>
    %103 = vector.broadcast %cst_45 : f32 to vector<4x256xf32>
    %104 = arith.select %102, %100, %103 : vector<4x256xi1>, vector<4x256xf32>
    %c8_46 = arith.constant 8 : index
    %c0_47 = arith.constant 0 : index
    %105 = vector.load %arg6[%c8_46, %c0_47] : memref<36x256xf32, #tpu.memory_space<vmem>>, vector<4x256xf32>
    tpu.vector_store %arg6[%c8_46, %c0_47], %104 {strides = array<i32>} : memref<36x256xf32, #tpu.memory_space<vmem>>, vector<4x256xf32>,
    %c1_i32_48 = arith.constant 1 : i32
    %106 = tpu.dynamic_rotate %87 by %c1_i32_48 dim 1 : vector<4x256xf32>, i32 -> vector<4x256xf32>
    %cst_49 = arith.constant 0.000000e+00 : f32
    %107 = vector.shape_cast %9 : vector<1x256xi1> to vector<1x256xi1>
    %108 = vector.broadcast %107 : vector<1x256xi1> to vector<4x256xi1>
    %109 = vector.broadcast %cst_49 : f32 to vector<4x256xf32>
    %110 = arith.select %108, %106, %109 : vector<4x256xi1>, vector<4x256xf32>
    %c12_50 = arith.constant 12 : index
    %c0_51 = arith.constant 0 : index
    %111 = vector.load %arg6[%c12_50, %c0_51] : memref<36x256xf32, #tpu.memory_space<vmem>>, vector<4x256xf32>
    tpu.vector_store %arg6[%c12_50, %c0_51], %110 {strides = array<i32>} : memref<36x256xf32, #tpu.memory_space<vmem>>, vector<4x256xf32>,
    %c16_52 = arith.constant 16 : index
    %c0_53 = arith.constant 0 : index
    %112 = vector.load %arg6[%c16_52, %c0_53] : memref<36x256xf32, #tpu.memory_space<vmem>>, vector<4x256xf32>
    tpu.vector_store %arg6[%c16_52, %c0_53], %87 {strides = array<i32>} : memref<36x256xf32, #tpu.memory_space<vmem>>, vector<4x256xf32>,
    %c255_i32_54 = arith.constant 255 : i32
    %113 = tpu.dynamic_rotate %87 by %c255_i32_54 dim 1 : vector<4x256xf32>, i32 -> vector<4x256xf32>
    %cst_55 = arith.constant 0.000000e+00 : f32
    %114 = vector.shape_cast %11 : vector<1x256xi1> to vector<1x256xi1>
    %115 = vector.broadcast %114 : vector<1x256xi1> to vector<4x256xi1>
    %116 = vector.broadcast %cst_55 : f32 to vector<4x256xf32>
    %117 = arith.select %115, %113, %116 : vector<4x256xi1>, vector<4x256xf32>
    %c20_56 = arith.constant 20 : index
    %c0_57 = arith.constant 0 : index
    %118 = vector.load %arg6[%c20_56, %c0_57] : memref<36x256xf32, #tpu.memory_space<vmem>>, vector<4x256xf32>
    tpu.vector_store %arg6[%c20_56, %c0_57], %117 {strides = array<i32>} : memref<36x256xf32, #tpu.memory_space<vmem>>, vector<4x256xf32>,
    %c241_i32_58 = arith.constant 241 : i32
    %119 = tpu.dynamic_rotate %87 by %c241_i32_58 dim 1 : vector<4x256xf32>, i32 -> vector<4x256xf32>
    %cst_59 = arith.constant 0.000000e+00 : f32
    %120 = vector.shape_cast %14 : vector<1x256xi1> to vector<1x256xi1>
    %121 = vector.broadcast %120 : vector<1x256xi1> to vector<4x256xi1>
    %122 = vector.broadcast %cst_59 : f32 to vector<4x256xf32>
    %123 = arith.select %121, %119, %122 : vector<4x256xi1>, vector<4x256xf32>
    %c24_60 = arith.constant 24 : index
    %c0_61 = arith.constant 0 : index
    %124 = vector.load %arg6[%c24_60, %c0_61] : memref<36x256xf32, #tpu.memory_space<vmem>>, vector<4x256xf32>
    tpu.vector_store %arg6[%c24_60, %c0_61], %123 {strides = array<i32>} : memref<36x256xf32, #tpu.memory_space<vmem>>, vector<4x256xf32>,
    %c240_i32_62 = arith.constant 240 : i32
    %125 = tpu.dynamic_rotate %87 by %c240_i32_62 dim 1 : vector<4x256xf32>, i32 -> vector<4x256xf32>
    %cst_63 = arith.constant 0.000000e+00 : f32
    %126 = vector.shape_cast %7 : vector<1x256xi1> to vector<1x256xi1>
    %127 = vector.broadcast %126 : vector<1x256xi1> to vector<4x256xi1>
    %128 = vector.broadcast %cst_63 : f32 to vector<4x256xf32>
    %129 = arith.select %127, %125, %128 : vector<4x256xi1>, vector<4x256xf32>
    %c28_64 = arith.constant 28 : index
    %c0_65 = arith.constant 0 : index
    %130 = vector.load %arg6[%c28_64, %c0_65] : memref<36x256xf32, #tpu.memory_space<vmem>>, vector<4x256xf32>
    tpu.vector_store %arg6[%c28_64, %c0_65], %129 {strides = array<i32>} : memref<36x256xf32, #tpu.memory_space<vmem>>, vector<4x256xf32>,
    %c239_i32_66 = arith.constant 239 : i32
    %131 = tpu.dynamic_rotate %87 by %c239_i32_66 dim 1 : vector<4x256xf32>, i32 -> vector<4x256xf32>
    %cst_67 = arith.constant 0.000000e+00 : f32
    %132 = vector.shape_cast %15 : vector<1x256xi1> to vector<1x256xi1>
    %133 = vector.broadcast %132 : vector<1x256xi1> to vector<4x256xi1>
    %134 = vector.broadcast %cst_67 : f32 to vector<4x256xf32>
    %135 = arith.select %133, %131, %134 : vector<4x256xi1>, vector<4x256xf32>
    %c32_68 = arith.constant 32 : index
    %c0_69 = arith.constant 0 : index
    %136 = vector.load %arg6[%c32_68, %c0_69] : memref<36x256xf32, #tpu.memory_space<vmem>>, vector<4x256xf32>
    tpu.vector_store %arg6[%c32_68, %c0_69], %135 {strides = array<i32>} : memref<36x256xf32, #tpu.memory_space<vmem>>, vector<4x256xf32>,
    %c0_70 = arith.constant 0 : index
    %c0_71 = arith.constant 0 : index
    %137 = vector.load %arg3[%c0_70, %c0_71] : memref<4x36xf32, #tpu.memory_space<vmem>>, vector<4x36xf32>
    %c0_72 = arith.constant 0 : index
    %c0_73 = arith.constant 0 : index
    %138 = vector.load %arg6[%c0_72, %c0_73] : memref<36x256xf32, #tpu.memory_space<vmem>>, vector<36x256xf32>
    %cst_74 = arith.constant dense<0.000000e+00> : vector<4x256xf32>
    %139 = tpu.matmul %137, %138, %cst_74 {dimension_numbers = #tpu.dot_dimension_numbers<[1], [0], [0], [1], [0, 0, 1, 1], [], []>} : vector<4x36xf32>, vector<36x256xf32>, vector<4x256xf32> -> vector<4x256xf32>
    %cst_75 = arith.constant dense<0.000000e+00> : vector<4xf32>
    %140 = vector.multi_reduction <add>, %139, %cst_75 [1] : vector<4x256xf32> to vector<4xf32>
    %141 = vector.shape_cast %140 : vector<4xf32> to vector<4x1xf32>
    %142 = arith.mulf %139, %139 : vector<4x256xf32>
    %cst_76 = arith.constant dense<0.000000e+00> : vector<4xf32>
    %143 = vector.multi_reduction <add>, %142, %cst_76 [1] : vector<4x256xf32> to vector<4xf32>
    %144 = vector.shape_cast %143 : vector<4xf32> to vector<4x1xf32>
    %cst_77 = arith.constant 3.906250e-03 : f32
    %145 = vector.broadcast %cst_77 : f32 to vector<4x1xf32>
    %146 = arith.mulf %141, %145 : vector<4x1xf32>
    %cst_78 = arith.constant 3.906250e-03 : f32
    %147 = vector.broadcast %cst_78 : f32 to vector<4x1xf32>
    %148 = arith.mulf %144, %147 : vector<4x1xf32>
    %149 = arith.mulf %146, %146 : vector<4x1xf32>
    %150 = arith.subf %148, %149 : vector<4x1xf32>
    %151 = vector.broadcast %146 : vector<4x1xf32> to vector<4x256xf32>
    %152 = arith.subf %139, %151 : vector<4x256xf32>
    %cst_79 = arith.constant 9.99999974E-6 : f32
    %153 = vector.broadcast %cst_79 : f32 to vector<4x1xf32>
    %154 = arith.addf %150, %153 : vector<4x1xf32>
    %155 = math.rsqrt %154 : vector<4x1xf32>
    %156 = vector.broadcast %155 : vector<4x1xf32> to vector<4x256xf32>
    %157 = arith.mulf %152, %156 : vector<4x256xf32>
    %158 = arith.addf %1, %157 : vector<4x256xf32>
    %c0_80 = arith.constant 0 : index
    %c0_81 = arith.constant 0 : index
    %c0_82 = arith.constant 0 : index
    %159 = vector.load %arg5[%c0_80, %c0_81, %c0_82] : memref<1x4x256xf32, #tpu.memory_space<vmem>>, vector<1x4x256xf32>
    %160 = vector.shape_cast %159 : vector<1x4x256xf32> to vector<4x256xf32>
    %161 = vector.shape_cast %158 : vector<4x256xf32> to vector<1x4x256xf32>
    tpu.vector_store %arg5[%c0_80, %c0_81, %c0_82], %161 {strides = array<i32>} : memref<1x4x256xf32, #tpu.memory_space<vmem>>, vector<1x4x256xf32>,
    return
  }
  func.func @transform_0(%arg0: i32) -> (i32, i32, i32) {
    %c0_i32 = arith.constant 0 : i32
    %c0_i32_0 = arith.constant 0 : i32
    %c0_i32_1 = arith.constant 0 : i32
    return %arg0, %c0_i32, %c0_i32_0 : i32, i32, i32
  }
  func.func @transform_1(%arg0: i32) -> (i32, i32) {
    %c0_i32 = arith.constant 0 : i32
    %c0_i32_0 = arith.constant 0 : i32
    %c0_i32_1 = arith.constant 0 : i32
    return %c0_i32, %c0_i32_0 : i32, i32
  }
  func.func @transform_2(%arg0: i32) -> (i32, i32) {
    %c0_i32 = arith.constant 0 : i32
    %c0_i32_0 = arith.constant 0 : i32
    %c0_i32_1 = arith.constant 0 : i32
    return %c0_i32, %c0_i32_0 : i32, i32
  }
  func.func @transform_3(%arg0: i32) -> (i32, i32) {
    %c0_i32 = arith.constant 0 : i32
    %c0_i32_0 = arith.constant 0 : i32
    %c0_i32_1 = arith.constant 0 : i32
    return %c0_i32, %c0_i32_0 : i32, i32
  }
  func.func @transform_4(%arg0: i32) -> (i32, i32, i32) {
    %c0_i32 = arith.constant 0 : i32
    %c0_i32_0 = arith.constant 0 : i32
    %c0_i32_1 = arith.constant 0 : i32
    return %arg0, %c0_i32, %c0_i32_0 : i32, i32, i32
  }
}

</mosaic_0001>

<bundles_post_ra>
// kernel: tpu_custom_call.1
= control target key start
LH: loop header
LB: loop body
LE: loop exit
PB: predicated region body
PF: predicated region fallthrough
CT: control target
= control target key end

     0   :  { %9 = vsyncpa [#allocation4], 0  ;;  %s1691_s0 = inlined_call_operand.hbm [shape: f32[2,4,256], index: 0, kind: input, shape index: {}]   ;;  %s1692_s1 = inlined_call_operand.hbm [shape: f32[4,36], index: 1, kind: input, shape index: {}]   ;;  %s1693_s2 = inlined_call_operand.hbm [shape: f32[4,36], index: 2, kind: input, shape index: {}]   ;;  %s1694_s3 = inlined_call_operand.hbm [shape: s32[2,256], index: 3, kind: input, shape index: {}]   ;;  %s1695_s4 = inlined_call_operand.hbm [shape: f32[2,4,256], index: 4, kind: output, shape index: {}]  }
   0x1   :  { %11 = vsyncpa [#allocation4 + $0x1], 0 }
   0x2   :  { %12 = vsyncpa [#allocation7], 0 }
   0x3   :  { %13 = vsyncpa [#allocation10], 0 }
   0x4   :  { %14 = vsyncpa [#allocation5], 0 }
   0x5   :  { %16 = vsyncpa [#allocation5 + $0x1], 0  ;;  %s1242_s15 = smov 0   ;;  %s1244_s16 = smov 0  }
   0x6   :  { %s1246_s17 = smov 0   ;;  %s1248_s18 = smov 0  }
   0x7 LB: > { %s1263_s19 = sadd.s32 4294967295, %s1203_s18   ;;  %s889_s20 = sadd.s32 4294967294, %s1203_s18   ;;  %s1203_s18 = sphi %s1248_s18, %s1779_s18   ;;  %s1199_s17 = sphi %s1246_s17, %s1778_s17   ;;  %s1195_s16 = sphi %s1244_s16, %s1777_s16   ;;  %s1191_s15 = sphi %s1242_s15, %s1776_s15  }
   0x8   : > { %p42_p0 = scmp.ne.s32.totalorder %s1195_s16, %s1191_s15  ;;  %p43_p1 = scmp.eq.s32.totalorder %s1263_s19, 0 }
   0x9   : > { %p129_p2 = scmp.eq.s32.totalorder %s1263_s19, 1  ;;  %p135_p3 = scmp.eq.s32.totalorder %s889_s20, 1 }
   0xa   : > { %p1272_p4 = por %p43_p1, %p42_p0  ;;  %p890_p5 = scmp.ge.s32.totalorder %s1203_s18, 1 }
   0xb   : > { %p1277_p6 = por %p135_p3, %p42_p0  ;;  %p142_p7 = scmp.lt.s32.totalorder %s1203_s18, 3 }
   0xc   : > { %s154_s25 = sshll.u32 %s1692_s1, 4  ;;  %s1205_s27 = smov [#allocation6]   ;;  %s155_s25 = int_to_ptr.hbm [resolvable:$true] %s154_s25 }
   0xd   : > { %p1285_p8 = pnand %p890_p5, %p142_p7  ;;  %s156_s28 = sshll.u32 %s1205_s27, 4  ;;  %s157_s28 = int_to_ptr.vmem [resolvable:$true] %s156_s28 }
   0xe   : > { %s166_s5 = sshll.u32 %s1693_s2, 4  ;;  %s178_s8 = sshll.u32 %s1694_s3, 4  ;;  %s167_s5 = int_to_ptr.hbm [resolvable:$true] %s166_s5  ;;  %s179_s8 = int_to_ptr.hbm [resolvable:$true] %s178_s8 }
   0xf   : > { %p935_p10 = pneg %p1285_p8  ;;  %s1206_s9 = smov [#allocation8]  }
  0x10   : > { %s168_s10 = sshll.u32 %s1206_s9, 4  ;;  %s1207_s11 = smov [#allocation9]   ;;  %s169_s10 = int_to_ptr.vmem [resolvable:$true] %s168_s10 }
  0x11   : > { %p936_p11 = pnand %p935_p10, %p43_p1  ;;  %s180_s12 = sshll.u32 %s1207_s11, 4  ;;  %s181_s12 = int_to_ptr.vmem [resolvable:$true] %s180_s12 }
  0x12   : > { %s1301_s13 = sadd.s32 1, %s1203_s18   ;;  %s29_s20 = sadd.s32 1, %s1199_s17 }
  0x13   : > { %938 = dma.hbm_to_vmem [thread:$0]  (!%p936_p11), %s155_s25, 64, %s157_s28, [#allocation7]  }
  0x14   : > { %941 = dma.hbm_to_vmem [thread:$0]  (!%p936_p11), %s167_s5, 64, %s169_s10, [#allocation7]  }
  0x15   : > { %944 = dma.hbm_to_vmem [thread:$0]  (!%p936_p11), %s179_s8, 64, %s181_s12, [#allocation10]  }
  0x16   : > { %s26_s14 = ssub.s32 %s1203_s18, %s1301_s13  ;;  %p36_p13 = scmp.ne.s32.totalorder %s1199_s17, %s1195_s16 }
  0x17   : > { %p27_p12 = scmp.eq.s32.totalorder %s26_s14, 0  ;;  %p37_p0 = scmp.eq.s32.totalorder %s1203_s18, 0 }
  0x18   : > { %p1314_p3 = por %p129_p2, %p36_p13  ;;  %p956_p5 = scmp.lt.s32.totalorder %s1203_s18, 2 }
  0x19   : > { %s1310_s23 = scalar_select %p27_p12, %s1199_s17, %s29_s20  }
  0x1a   : > { %s191_s25 = sand.u32 1, %s1199_s17   ;;  %s917_s27 = sshll.u32 %s1203_s18, 3 }
  0x1b   : > { %p38_p7 = por %p37_p0, %p36_p13  ;;  %s895_s28 = sshll.u32 %s191_s25, 3 }
  0x1c   : > { %s200_s5 = scalar_lea.hbm %s1691_s0, %s917_s27  ;;  %s195_s7 = scalar_lea.vmem [#allocation3], %s895_s28 }
  0x1d   : > { %s202_s6 = sshll.u32 %s200_s5, 4  ;;  %s204_s8 = sshll.u32 %s195_s7, 4  ;;  %s203_s6 = int_to_ptr.hbm [resolvable:$true] %s202_s6  ;;  %s205_s8 = int_to_ptr.vmem [resolvable:$true] %s204_s8 }
  0x1e   : > { %p1324_p10 = pnand %p956_p5, %p38_p7  ;;  %s192_s10 = scalar_lea.sflag [#allocation4], %s191_s25 }
  0x1f   : > { %s1099_s11 = sshra.s32 %s203_s6, 4  ;;  %s1106_s27 = scalar_lea.hbm %s1691_s0, 16  ;;  %s1100_s11 = int_to_ptr.hbm [resolvable:$true] %s1099_s11 }
  0x20   : > { %s1101_s12 = scalar_lea.hbm %s1100_s11, 8  ;;  %p1103_p11 = pneg %p1324_p10 }
  0x21   : > { %p1102_p2 = scmp.ne.s32.totalorder %s1100_s11, %s1101_s12  ;;  %p1107_p0 = scmp.lt.s32.totalorder %s1100_s11, %s1691_s0 }
  0x22   : > { %p1108_p5 = scmp.lt.s32.totalorder %s1106_s27, %s1101_s12 }
  0x23   : > { %p1104_p12 = pnand %p1103_p11, %p1102_p2 }
  0x24   : > { %p1109_p7 = por %p1108_p5, %p1107_p0 }
  0x25   : > { %p1105_p13 = pneg %p1104_p12 }
  0x27   : > { %p1110_p9 = pnand %p1109_p7, %p1105_p13 }
  0x29   : > { %1113 = shalt.err (!%p1110_p9)
}
  0x2a   : > { %948 = dma.hbm_to_vmem [thread:$0]  (!%p1324_p10), %s203_s6, 128, %s205_s8, %s192_s10  }
  0x2b   : > { %213 = sbr.rel (%p1285_p8) target bundleno = 1033 (0x409), region = 36  ;;  %s1341_s25 = sand.u32 (!%p1285_p8), 1, %s1195_s16  }
  0x2c   : > { %s899_s30 = sshll.u32 (!%p1285_p8), %s1341_s25, 3  ;;  %s216_s5 = scalar_lea.sflag (!%p1285_p8), [#allocation4], %s1341_s25 }
  0x2d   : > { %s219_s7 = scalar_lea.vmem (!%p1285_p8), [#allocation3], %s899_s30 }
  0x30   : > { %1174 = dma.done.wait (%p1272_p4), %s216_s5, 128  }
  0x31   : > { %1176 = vsyncadd (%p1272_p4), %s216_s5, 4294967168 }
  0x32   : > { %1178 = dma.done.wait (%p43_p1), [#allocation7], 128  }
  0x33   : > { %1180 = vsyncadd (%p43_p1), [#allocation7], 4294967168 }
  0x34   : > { %1182 = dma.done.wait (%p43_p1), [#allocation10], 64  }
  0x35   : > { %1184 = vsyncadd (%p43_p1), [#allocation10], 4294967232  ;;  %v1359_v0 = vld [vmem:[%s219_s7] sm:$0xff]  ;;  %s1208_s21 = smov 16   ;;  %s1209_s26 = smov 15   ;;  %v282_v21 = vlaneseq  ;;  %v1216_v22 = vmov 0  }
  0x36   : > { %273 = vst [vmem:[#allocation1] ss:$2 sm:$0xff] %v1359_v0  ;;  %s1210_s6 = smov 1   ;;  %s1211_s8 = smov 127   ;;  %v1721_v44 = vmov 0 }
  0x37   : > { %s1212_s9 = smov 113   ;;  %s1213_s10 = smov 112   ;;  %v1386_v19 = vld [vmem:[#allocation9] ss:$2 sm:$0x3]  ;;  %v1392_v24 = vand.u32 127, %v282_v21 }
  0x38   : > { %s1214_s11 = smov 17   ;;  %s1215_s12 = smov 111   ;;  %vm264_vm0 = vcmp.ge.s32.totalorder %v1386_v19, 1  ;;  %v263_v35 = vld [vmem:[#allocation9 + $0x1] ss:$2 sm:$0x3] }
  0x39   : > { %v308_v23 = vsel %vm264_vm0, 1, %v1216_v22  ;;  %vm1699_vm1 = vcmp.lt.s32.totalorder %v1392_v24, 16  ;;  %vm266_vm4 = vcmp.ge.s32.totalorder %v263_v35, 1  ;;  %vm1696_vm5 = vcmp.lt.s32.totalorder %v1392_v24, 1  ;;  %s918_s14 = sshll.u32 %s1263_s19, 3  ;;  %s259_s29 = scalar_lea.vmem [#allocation11], %s899_s30 }
  0x3a   : > { %v309_v25 = vperm.slane %v308_v23, 0  ;;  %v310_v26 = vperm.slane %v308_v23, 1  ;;  %v356_v39 = vsel %vm266_vm4, 1, %v1216_v22  ;;  %vm267_vm8 = vcmp.le.s32.totalorder %v263_v35, 14  ;;  %s785_s28 = scalar_lea.hbm %s1695_s4, %s918_s14  ;;  %s787_s5 = sshll.u32 %s259_s29, 4  ;;  %s788_s5 = int_to_ptr.vmem [resolvable:$true] %s787_s5 }
  0x3b   : > { %v357_v41 = vperm.slane %v356_v39, 0  ;;  %v358_v42 = vperm.slane %v356_v39, 1  ;;  %vm1697_vm9 = vcmp.lt.s32.totalorder %v1392_v24, 127  ;;  %v390_v48 = vsel %vm267_vm8, 1, %v1216_v22  ;;  %vm269_vm15 = vmand %vm264_vm0, %vm267_vm8  ;;  %s789_s7 = sshll.u32 %s785_s28, 4  ;;  %s774_s19 = scalar_lea.sflag [#allocation5], %s1341_s25  ;;  %s790_s7 = int_to_ptr.hbm [resolvable:$true] %s789_s7 }
  0x3c   : > { %vm1395_vm2 = vcmp.eq.s32.totalorder %v309_v25, 1  ;;  %vm1399_vm3 = vcmp.eq.s32.totalorder %v310_v26, 1  ;;  %v391_v51 = vperm.slane %v390_v48, 0  ;;  %v392_v52 = vperm.slane %v390_v48, 1  ;;  %s1149_s30 = scalar_lea.hbm %s1695_s4, 16 }
  0x3d   : > { %v274_v1 = vld.sshfl [vmem:[#allocation1] sm:$0xff pattern:$0x75316420]  ;;  %v275_v2 = vld.sshfl [vmem:[#allocation1 + $0x8] sm:$0xff pattern:$0x75316420] }
  0x3e   : > { %296 = vst [vmem:[#allocation1] ss:$2 sm:$0xff] %v1359_v0  ;;  %vm1416_vm6 = vcmp.eq.s32.totalorder %v357_v41, 1  ;;  %vm1420_vm7 = vcmp.eq.s32.totalorder %v358_v42, 1  ;;  %vm1439_vm10 = vcmp.eq.s32.totalorder %v391_v51, 1  ;;  %vm1443_vm11 = vcmp.eq.s32.totalorder %v392_v52, 1 }
  0x3f   : > { %v1722_v44 = vsel %vm1420_vm7, 4294967295, %v1721_v44  ;;  %vm265_vm12 = vcmp.le.s32.totalorder %v1386_v19, 14  ;;  %vm1698_vm14 = vcmp.lt.s32.totalorder %v1392_v24, 113  ;;  %v1737_v39 = vmov 0 }
  0x40   : > { %vm270_vm13 = vmand %vm265_vm12, %vm266_vm4 }
  0x45   : > { %v297_v3 = vld.sshfl [vmem:[#allocation1] sm:$0xff pattern:$0x75316420]  ;;  %v298_v4 = vld.sshfl [vmem:[#allocation1 + $0x8] sm:$0xff pattern:$0x75316420] }
  0x46   : > { %323 = vst [vmem:[#allocation1] ss:$2 sm:$0xff] %v1359_v0  ;;  %301 = vrot.lane.b32.xlu1 %v297_v3, %s1208_s21  ;;  %303 = vrot.lane.b32.xlu2 %v298_v4, %s1208_s21 }
  0x4d   : > { %v324_v5 = vld.sshfl [vmem:[#allocation1] sm:$0xff pattern:$0x75316420]  ;;  %v325_v6 = vld.sshfl [vmem:[#allocation1 + $0x8] sm:$0xff pattern:$0x75316420] }
  0x4e   : > { %328 = vrot.lane.b32.xlu0 %v324_v5, %s1209_s26  ;;  %344 = vst [vmem:[#allocation1] ss:$2 sm:$0xff] %v1359_v0 }
  0x55   : > { %v345_v7 = vld.sshfl [vmem:[#allocation1] sm:$0xff pattern:$0x75316420]  ;;  %v346_v8 = vld.sshfl [vmem:[#allocation1 + $0x8] sm:$0xff pattern:$0x75316420] }
  0x56   : > { %351 = vrot.lane.b32.xlu0 %v346_v8, %s1210_s6  ;;  %371 = vst [vmem:[#allocation1] ss:$2 sm:$0xff] %v1359_v0  ;;  %349 = vrot.lane.b32.xlu2 %v345_v7, %s1210_s6 }
  0x5d   : > { %v372_v9 = vld.sshfl [vmem:[#allocation1] sm:$0xff pattern:$0x75316420]  ;;  %v373_v10 = vld.sshfl [vmem:[#allocation1 + $0x8] sm:$0xff pattern:$0x75316420] }
  0x5e   : > { %378 = vst [vmem:[#allocation1] ss:$2 sm:$0xff] %v1359_v0 }
  0x5f   : > { %376 = vst [vmem:[#allocation2 + $0x48] sm:$0xf] %v372_v9 }
  0x60   : > { %377 = vst [vmem:[#allocation2 + $0x28] sm:$0xf] %v373_v10 }
  0x65   : > { %v379_v11 = vld.sshfl [vmem:[#allocation1] sm:$0xff pattern:$0x75316420]  ;;  %v380_v12 = vld.sshfl [vmem:[#allocation1 + $0x8] sm:$0xff pattern:$0x75316420] }
  0x66   : > { %405 = vst [vmem:[#allocation1] ss:$2 sm:$0xff] %v1359_v0  ;;  %383 = vrot.lane.b32.xlu2 %v379_v11, %s1211_s8 }
  0x6d   : > { %v406_v13 = vld.sshfl [vmem:[#allocation1] sm:$0xff pattern:$0x75316420]  ;;  %v407_v14 = vld.sshfl [vmem:[#allocation1 + $0x8] sm:$0xff pattern:$0x75316420] }
  0x6e   : > { %410 = vrot.lane.b32.xlu0 %v406_v13, %s1212_s9  ;;  %412 = vrot.lane.b32.xlu1 %v407_v14, %s1212_s9  ;;  %426 = vst [vmem:[#allocation1] ss:$2 sm:$0xff] %v1359_v0  ;;  %v438_v14 = vsel %vm265_vm12, 1, %v1216_v22 }
  0x6f   : > { %385 = vrot.lane.b32.xlu2 %v380_v12, %s1211_s8 }
  0x75   : > { %v427_v15 = vld.sshfl [vmem:[#allocation1] sm:$0xff pattern:$0x75316420]  ;;  %v428_v16 = vld.sshfl [vmem:[#allocation1 + $0x8] sm:$0xff pattern:$0x75316420] }
  0x76   : > { %431 = vrot.lane.b32.xlu0 %v427_v15, %s1213_s10  ;;  %453 = vst [vmem:[#allocation1] ss:$2 sm:$0xff] %v1359_v0  ;;  %v439_v15 = vperm.slane %v438_v14, 0 }
  0x77   : > { %278 = vrot.lane.b32.xlu2 %v274_v1, %s1214_s11  ;;  %v417_v1 = vsel %vm270_vm13, 1, %v1216_v22  ;;  %vm268_vm13 = vmand %vm264_vm0, %vm266_vm4  ;;  %vm1701_vm0 = vcmp.lt.s32.totalorder %v1392_v24, 17  ;;  %vm1702_vm4 = vcmp.lt.s32.totalorder %v1392_v24, 111 }
  0x78   : > { %v419_v3 = vperm.slane %v417_v1, 1 }
  0x7d   : > { %v454_v17 = vld.sshfl [vmem:[#allocation1] sm:$0xff pattern:$0x75316420]  ;;  %v455_v18 = vld.sshfl [vmem:[#allocation1 + $0x8] sm:$0xff pattern:$0x75316420] }
  0x7e   : > { %433 = vrot.lane.b32.xlu0 %v428_v16, %s1213_s10  ;;  %458 = vrot.lane.b32.xlu1 %v454_v17, %s1215_s12  ;;  %v440_v16 = vperm.slane %v438_v14, 1 }
  0x86   : > { %280 = vrot.lane.b32.xlu0 %v275_v2, %s1214_s11  ;;  %460 = vrot.lane.b32.xlu1 %v455_v18, %s1215_s12  ;;  %v418_v2 = vperm.slane %v417_v1, 0 }
  0x8e   : > { %330 = vrot.lane.b32.xlu1 %v325_v6, %s1209_s26  ;;  %v335_v6 = vsel %vm269_vm15, 1, %v1216_v22  ;;  %vm271_vm15 = vmand %vm265_vm12, %vm267_vm8 }
  0x8f   : > { %v465_v25 = vsel %vm271_vm15, 1, %v1216_v22 }
  0x90   : > { %v466_v35 = vperm.slane %v465_v25, 0 }
  0xa0   : > { %v304_v20 = vpop.permute.xlu2 %303 }
  0xb0   : > { %v350_v27 = vpop.permute.xlu2 %349 }
  0xb8   : > { %v302_v30 = vpop.permute.xlu1 %301 }
  0xb9   : > { %v306_v31 = vsel %vm1699_vm1, %v302_v30, %v304_v20  ;;  %v307_v32 = vsel %vm1699_vm1, %v304_v20, %v302_v30  ;;  %vm1487_vm1 = vcmp.eq.s32.totalorder %v439_v15, 1  ;;  %v287_v20 = vsel %vm268_vm13, 1, %v1216_v22 }
  0xba   : > { %v313_v33 = vsel %vm1395_vm2, %v307_v32, 0.0  ;;  %v314_v34 = vsel %vm1399_vm3, %v306_v31, 0.0  ;;  %v288_v31 = vperm.slane %v287_v20, 0  ;;  %vm1515_vm13 = vcmp.eq.s32.totalorder %v466_v35, 1 }
  0xbb   : > { %v317_v36 = vrot.slane %v313_v33, 4  ;;  %v318_v37 = vrot.slane %v314_v34, 4  ;;  %v289_v34 = vperm.slane %v287_v20, 1 }
  0xbc   : > { %vm1507_vm8 = vcmp.eq.s32.totalorder %v288_v31, 1 }
  0xbd   : > { %321 = vst [vmem:[#allocation2 + $0x30] sm:$0xf0] %v317_v36  ;;  %v467_v36 = vperm.slane %v465_v25, 1  ;;  %vm1511_vm12 = vcmp.eq.s32.totalorder %v289_v34, 1 }
  0xbe   : > { %322 = vst [vmem:[#allocation2] sm:$0xf0] %v318_v37  ;;  %v1735_v37 = vmov 0  ;;  %v1738_v39 = vsel %vm1511_vm12, 4294967295, %v1737_v39 }
  0xbf   : > { %v1736_v37 = vsel %vm1507_vm8, 4294967295, %v1735_v37  ;;  %vm1519_vm15 = vcmp.eq.s32.totalorder %v467_v36, 1 }
  0xc0   : > { %v1411_v38 = vpop.permute.xlu0 %328  ;;  %v384_v40 = vpop.permute.xlu2 %383 }
  0xc8   : > { %v352_v45 = vpop.permute.xlu0 %351 }
  0xc9   : > { %v354_v46 = vsel %vm1696_vm5, %v350_v27, %v352_v45  ;;  %v355_v47 = vsel %vm1696_vm5, %v352_v45, %v350_v27  ;;  %v386_v53 = vpop.permute.xlu2 %385  ;;  %vm1460_vm5 = vcmp.eq.s32.totalorder %v418_v2, 1 }
  0xca   : > { %v361_v49 = vsel %vm1416_vm6, %v355_v47, 0.0  ;;  %v362_v50 = vsel %vm1420_vm7, %v354_v46, 0.0  ;;  %v388_v56 = vsel %vm1697_vm9, %v384_v40, %v386_v53  ;;  %v389_v57 = vsel %vm1697_vm9, %v386_v53, %v384_v40 }
  0xcb   : > { %v365_v54 = vrot.slane %v361_v49, 4  ;;  %v366_v55 = vrot.slane %v362_v50, 4  ;;  %v395_v60 = vsel %vm1439_vm10, %v388_v56, 0.0  ;;  %v396_v61 = vsel %vm1443_vm11, %v389_v57, 0.0 }
  0xcc   : > { %v399_v62 = vrot.slane %v395_v60, 4  ;;  %v400_v63 = vrot.slane %v396_v61, 4  ;;  %vm1464_vm9 = vcmp.eq.s32.totalorder %v419_v3, 1  ;;  %vm1491_vm7 = vcmp.eq.s32.totalorder %v440_v16, 1 }
  0xcd   : > { %369 = vst [vmem:[#allocation2 + $0x18] sm:$0xf0] %v365_v54  ;;  %v336_v54 = vperm.slane %v335_v6, 0  ;;  %v1745_v57 = vmov 0 }
  0xce   : > { %370 = vst [vmem:[#allocation2 + $0x10] sm:$0xf0] %v366_v55  ;;  %v337_v55 = vperm.slane %v335_v6, 1 }
  0xcf   : > { %403 = vst [vmem:[#allocation2 + $0x48] sm:$0xf0] %v399_v62 }
  0xd0   : > { %404 = vst [vmem:[#allocation2 + $0x28] sm:$0xf0] %v400_v63 }
  0xd1   : > { %v279_v22 = vpop.permute.xlu2 %278 }
  0xe0   : > { %v411_v7 = vpop.permute.xlu0 %410  ;;  %v413_v8 = vpop.permute.xlu1 %412 }
  0xe1   : > { %v415_v9 = vsel %vm1698_vm14, %v411_v7, %v413_v8  ;;  %v416_v10 = vsel %vm1698_vm14, %v413_v8, %v411_v7  ;;  %vm1703_vm14 = vcmp.lt.s32.totalorder %v1392_v24, 112  ;;  %v480_v8 = vld [vmem:[#allocation2 + $0x28] sm:$0xff] }
  0xe2   : > { %v422_v11 = vsel %vm1460_vm5, %v415_v9, 0.0  ;;  %v423_v12 = vsel %vm1464_vm9, %v416_v10, 0.0 }
  0xe3   : > { %424 = vst [vmem:[#allocation2 + $0x8] sm:$0xf] %v422_v11  ;;  %v474_v11 = vld [vmem:[#allocation6] sm:$0xf] }
  0xe4   : > { %425 = vst [vmem:[#allocation2 + $0x20] sm:$0xf] %v423_v12 }
  0xe8   : > { %v432_v13 = vpop.permute.xlu0 %431 }
  0xf0   : > { %v434_v21 = vpop.permute.xlu0 %433  ;;  %v459_v23 = vpop.permute.xlu1 %458 }
  0xf1   : > { %v436_v19 = vsel %vm1703_vm14, %v432_v13, %v434_v21  ;;  %v437_v26 = vsel %vm1703_vm14, %v434_v21, %v432_v13  ;;  %vm1544_vm14 = vcmp.eq.s32.totalorder %v337_v55, 1 }
  0xf2   : > { %v443_v27 = vsel %vm1487_vm1, %v436_v19, 0.0  ;;  %v444_v30 = vsel %vm1491_vm7, %v437_v26, 0.0  ;;  %v1746_v57 = vsel %vm1544_vm14, 4294967295, %v1745_v57 }
  0xf3   : > { %v447_v32 = vrot.slane %v443_v27, 4  ;;  %v448_v33 = vrot.slane %v444_v30, 4 }
  0xf5   : > { %451 = vst [vmem:[#allocation2 + $0x8] sm:$0xf0] %v447_v32 }
  0xf6   : > { %452 = vst [vmem:[#allocation2 + $0x20] sm:$0xf0] %v448_v33 }
  0xf8   : > { %v281_v41 = vpop.permute.xlu0 %280  ;;  %v461_v45 = vpop.permute.xlu1 %460 }
  0xf9   : > { %v285_v46 = vsel %vm1701_vm0, %v279_v22, %v281_v41  ;;  %v286_v47 = vsel %vm1701_vm0, %v281_v41, %v279_v22  ;;  %v463_v48 = vsel %vm1702_vm4, %v459_v23, %v461_v45  ;;  %v464_v49 = vsel %vm1702_vm4, %v461_v45, %v459_v23 }
  0xfa   : > { %v292_v50 = vsel %vm1507_vm8, %v286_v47, 0.0  ;;  %v293_v51 = vsel %vm1511_vm12, %v285_v46, 0.0  ;;  %v470_v52 = vsel %vm1515_vm13, %v463_v48, 0.0  ;;  %v471_v53 = vsel %vm1519_vm15, %v464_v49, 0.0 }
  0xfb   : > { %294 = vst [vmem:[#allocation2 + $0x30] sm:$0xf] %v292_v50  ;;  %vm1705_vm0 = vcmp.lt.s32.totalorder %v1392_v24, 15  ;;  %vm1540_vm4 = vcmp.eq.s32.totalorder %v336_v54, 1  ;;  %vm1708_vm12 = vcmask 1043456  }
  0xfc   : > { %295 = vst [vmem:[#allocation2] sm:$0xf] %v293_v51  ;;  %v481_v6 = vld [vmem:[#allocation2 + $0x8] sm:$0xff] }
  0xfd   : > { %472 = vst [vmem:[#allocation2 + $0x40] sm:$0xf] %v470_v52  ;;  %v482_v7 = vld [vmem:[#allocation2 + $0x20] sm:$0xff] }
  0xfe   : > { %473 = vst [vmem:[#allocation2 + $0x38] sm:$0xf] %v471_v53 }
 0x100   : > { %v331_v60 = vpop.permute.xlu1 %330 }
 0x101   : > { %v333_v61 = vsel %vm1705_vm0, %v1411_v38, %v331_v60  ;;  %v334_v62 = vsel %vm1705_vm0, %v331_v60, %v1411_v38  ;;  %v479_v38 = vld [vmem:[#allocation2 + $0x48] sm:$0xff]  ;;  %vm1706_vm0 = vcmask 293888  }
 0x102   : > { %v340_v63 = vsel %vm1540_vm4, %v334_v62, 0.0  ;;  %v341_v1 = vsel %vm1544_vm14, %v333_v61, 0.0  ;;  %v475_v12 = vld [vmem:[#allocation2 + $0x30] sm:$0xff] }
 0x103   : > { %342 = vst [vmem:[#allocation2 + $0x18] sm:$0xf] %v340_v63  ;;  %v476_v13 = vld [vmem:[#allocation2] sm:$0xff] }
 0x104   : > { %343 = vst [vmem:[#allocation2 + $0x10] sm:$0xf] %v341_v1  ;;  %v483_v2 = vld [vmem:[#allocation2 + $0x40] sm:$0xf] }
 0x105   : > { %904 = vmatpush.msk.msra.mxu0 %vm1708_vm12, %v483_v2  ;;  %v484_v3 = vld [vmem:[#allocation2 + $0x38] sm:$0xf] }
 0x106   : > { %906 = vmatpush.msk.msra.mxu1 %vm1708_vm12, %v484_v3 }
 0x107   : > { %508 = vmatpush.msra.mxu0 %v481_v6 }
 0x108   : > { %528 = vmatpush.msra.mxu1 %v482_v7 }
 0x109   : > { %509 = vmatpush.msra.mxu0 %v479_v38 }
 0x10a   : > { %529 = vmatpush.msra.mxu1 %v480_v8  ;;  %v477_v9 = vld [vmem:[#allocation2 + $0x18] sm:$0xff] }
 0x10b   : > { %510 = vmatpush.msra.mxu0 %v477_v9  ;;  %v478_v10 = vld [vmem:[#allocation2 + $0x10] sm:$0xff] }
 0x10c   : > { %530 = vmatpush.msra.mxu1 %v478_v10 }
 0x10d   : > { %511 = vmatpush.msra.mxu0 %v475_v12 }
 0x10e   : > { %531 = vmatpush.msra.mxu1 %v476_v13  ;;  %905 = vmatmul.msk.f32.vlgmr.msra.gmra.mxu0 %vm1706_vm0, %v474_v11 }
 0x10f   : > { %907 = vmatmul.msk.f32.vlgmr.msra.gmra.mxu1 %vm1706_vm0, %v474_v11 }
 0x18b   : > { %v513_v14 = vpop.f32.mrf.mxu0 }
 0x18c   : > { %v536_v15 = vsel %vm1708_vm12, %v513_v14, 0.0  ;;  %v541_v16 = vmul.f32 %v513_v14, %v513_v14  ;;  %v533_v20 = vpop.f32.mrf.mxu1 }
 0x18d   : > { %v537_v21 = vsel %vm1708_vm12, %v533_v20, 0.0  ;;  %v542_v23 = vmul.f32 %v533_v20, %v533_v20 }
 0x18e   : > { %v538_v25 = vadd.f32 %v537_v21, %v536_v15  ;;  %v543_v19 = vsel %vm1708_vm12, %v541_v16, 0.0 }
 0x18f   : > { %v544_v26 = vsel %vm1708_vm12, %v542_v23, 0.0 }
 0x190   : > { %539 = vadd.xlane.f32.xlu1 %v538_v25  ;;  %v545_v27 = vadd.f32 %v544_v26, %v543_v19 }
 0x192   : > { %546 = vadd.xlane.f32.xlu2 %v545_v27 }
 0x203   : > { %v540_v30 = vpop.xlane.xlu1 %539 }
 0x204   : > { %v548_v31 = vmul.f32 0.00390625, %v540_v30 }
 0x205   : > { %v547_v32 = vpop.xlane.xlu2 %546 }
 0x206   : > { %v549_v33 = vmul.f32 0.00390625, %v547_v32  ;;  %v550_v34 = vmul.f32 %v548_v31, %v548_v31  ;;  %v552_v49 = vsub.f32 %v513_v14, %v548_v31  ;;  %v553_v50 = vsub.f32 %v533_v20, %v548_v31 }
 0x208   : > { %v551_v35 = vsub.f32 %v549_v33, %v550_v34 }
 0x20a   : > { %v554_v36 = vadd.f32 1e-05, %v551_v35 }
 0x20c   : > { %1005 = vrsqrt.f32 %v554_v36  ;;  %vm561_vm8 = vweird.f32 %v554_v36 }
 0x212   : > { %v1006_v22 = vpop.eup %1005 }
 0x213   : > { %v556_v41 = vmul.f32 %v1006_v22, %v554_v36  ;;  %vm562_vm0 = vweird.f32 %v1006_v22 }
 0x214   : > { %vm563_vm12 = vmor %vm561_vm8, %vm562_vm0  ;;  %vm1747_vm0 = vcmp.lt.s32.totalorder %v1392_v24, 16 }
 0x215   : > { %v557_v45 = vmul.f32 %v1006_v22, %v556_v41  ;;  %vm1748_vm8 = vmmov %vm1747_vm0 }
 0x217   : > { %v558_v46 = vmul.f32 0.5, %v557_v45 }
 0x219   : > { %v559_v47 = vsub.f32 1.5, %v558_v46 }
 0x21b   : > { %v560_v48 = vmul.f32 %v1006_v22, %v559_v47 }
 0x21d   : > { %v564_v51 = vsel %vm563_vm12, %v1006_v22, %v560_v48  ;;  %vm1749_vm12 = vcmp.lt.s32.totalorder %v1392_v24, 112 }
 0x21e   : > { %v565_v52 = vmul.f32 %v564_v51, %v552_v49  ;;  %v566_v53 = vmul.f32 %v564_v51, %v553_v50  ;;  %vm1750_vm14 = vmmov %vm1749_vm12 }
 0x220   : > { %v567_v54 = vmax.f32 %v565_v52, 0.0  ;;  %v568_v55 = vmax.f32 %v566_v53, 0.0 }
 0x222   : > { %621 = vst [vmem:[#allocation2 + $0x48] sm:$0xf] %v567_v54  ;;  %625 = vrot.lane.b32.xlu2 %v568_v55, %s1211_s8  ;;  %639 = vrot.lane.b32.xlu1 %v567_v54, %s1212_s9 }
 0x223   : > { %622 = vst [vmem:[#allocation2 + $0x28] sm:$0xf] %v568_v55  ;;  %649 = vrot.lane.b32.xlu0 %v567_v54, %s1213_s10 }
 0x22a   : > { %579 = vrot.lane.b32.xlu2 %v567_v54, %s1208_s21  ;;  %581 = vrot.lane.b32.xlu1 %v568_v55, %s1208_s21  ;;  %s1143_s21 = sshra.s32 %s790_s7, 4  ;;  %s1144_s21 = int_to_ptr.hbm [resolvable:$true] %s1143_s21 }
 0x22b   : > { %651 = vrot.lane.b32.xlu0 %v568_v55, %s1213_s10  ;;  %p1150_p9 = scmp.lt.s32.totalorder %s1144_s21, %s1695_s4 }
 0x232   : > { %597 = vrot.lane.b32.xlu2 %v568_v55, %s1209_s26  ;;  %569 = vrot.lane.b32.xlu1 %v567_v54, %s1214_s11 }
 0x233   : > { %665 = vrot.lane.b32.xlu0 %v567_v54, %s1215_s12 }
 0x23b   : > { %667 = vrot.lane.b32.xlu0 %v568_v55, %s1215_s12 }
 0x243   : > { %623 = vrot.lane.b32.xlu0 %v567_v54, %s1211_s8 }
 0x24b   : > { %641 = vrot.lane.b32.xlu0 %v568_v55, %s1212_s9 }
 0x253   : > { %605 = vrot.lane.b32.xlu0 %v567_v54, %s1210_s6 }
 0x25b   : > { %607 = vrot.lane.b32.xlu0 %v568_v55, %s1210_s6 }
 0x263   : > { %595 = vrot.lane.b32.xlu0 %v567_v54, %s1209_s26  ;;  %s1145_s26 = scalar_lea.hbm %s1144_s21, 8 }
 0x264   : > { %p1146_p1 = scmp.ne.s32.totalorder %s1144_s21, %s1145_s26  ;;  %p1151_p10 = scmp.lt.s32.totalorder %s1149_s30, %s1145_s26 }
 0x266   : > { %p1147_p4 = pnand %p1146_p1, %p1314_p3  ;;  %p1152_p2 = por %p1151_p10, %p1150_p9 }
 0x268   : > { %p1148_p8 = pneg %p1147_p4 }
 0x26a   : > { %p1153_p11 = pnand %p1152_p2, %p1148_p8 }
 0x26b   : > { %571 = vrot.lane.b32.xlu0 %v568_v55, %s1214_s11 }
 0x27c   : > { %v626_v60 = vpop.permute.xlu2 %625 }
 0x284   : > { %v580_v63 = vpop.permute.xlu2 %579 }
 0x28c   : > { %v598_v50 = vpop.permute.xlu2 %597 }
 0x294   : > { %v640_v61 = vpop.permute.xlu1 %639 }
 0x295   : > { %v650_v62 = vpop.permute.xlu0 %649 }
 0x29c   : > { %v582_v1 = vpop.permute.xlu1 %581 }
 0x29d   : > { %v583_v2 = vsel %vm1747_vm0, %v580_v63, %v582_v1  ;;  %v584_v3 = vsel %vm1748_vm8, %v582_v1, %v580_v63  ;;  %v652_v6 = vpop.permute.xlu0 %651  ;;  %v675_v1 = vld [vmem:[#allocation8] sm:$0xf] }
 0x29e   : > { %v585_v7 = vsel %vm1395_vm2, %v584_v3, 0.0  ;;  %v586_v38 = vsel %vm1399_vm3, %v583_v2, 0.0  ;;  %v653_v8 = vsel %vm1749_vm12, %v650_v62, %v652_v6  ;;  %v654_v9 = vsel %vm1750_vm14, %v652_v6, %v650_v62 }
 0x29f   : > { %v589_v10 = vrot.slane %v585_v7, 4  ;;  %v590_v11 = vrot.slane %v586_v38, 4  ;;  %v655_v12 = vsel %vm1487_vm1, %v653_v8, 0.0  ;;  %v656_v13 = vsel %vm1491_vm7, %v654_v9, 0.0 }
 0x2a0   : > { %v659_v14 = vrot.slane %v655_v12, 4  ;;  %v660_v28 = vrot.slane %v656_v13, 4  ;;  %vm1751_vm2 = vcmp.lt.s32.totalorder %v1392_v24, 111  ;;  %vm1753_vm1 = vcmp.lt.s32.totalorder %v1392_v24, 127 }
 0x2a1   : > { %593 = vst [vmem:[#allocation2 + $0x30] sm:$0xf0] %v589_v10  ;;  %vm1752_vm3 = vmmov %vm1751_vm2  ;;  %vm1755_vm14 = vcmask 1043456   ;;  %vm1765_vm12 = vcmp.lt.s32.totalorder %v1392_v24, 17 }
 0x2a2   : > { %594 = vst [vmem:[#allocation2] sm:$0xf0] %v590_v11  ;;  %vm1754_vm7 = vmmov %vm1753_vm1 }
 0x2a3   : > { %663 = vst [vmem:[#allocation2 + $0x8] sm:$0xf0] %v659_v14 }
 0x2a4   : > { %664 = vst [vmem:[#allocation2 + $0x20] sm:$0xf0] %v660_v28 }
 0x2a5   : > { %v666_v29 = vpop.permute.xlu0 %665 }
 0x2ad   : > { %v668_v15 = vpop.permute.xlu0 %667 }
 0x2ae   : > { %v669_v16 = vsel %vm1751_vm2, %v666_v29, %v668_v15  ;;  %v670_v20 = vsel %vm1752_vm3, %v668_v15, %v666_v29  ;;  %vm1766_vm2 = vmmov %vm1765_vm12  ;;  %vm1767_vm3 = vnez %v1736_v37 }
 0x2af   : > { %v671_v17 = vsel %vm1515_vm13, %v669_v16, 0.0  ;;  %v672_v18 = vsel %vm1519_vm15, %v670_v20, 0.0  ;;  %vm1756_vm13 = vmmov %vm1755_vm14  ;;  %vm1757_vm15 = vcmp.lt.s32.totalorder %v1392_v24, 113 }
 0x2b0   : > { %673 = vst [vmem:[#allocation2 + $0x40] sm:$0xf] %v671_v17  ;;  %vm1758_vm0 = vmmov %vm1757_vm15 }
 0x2b1   : > { %674 = vst [vmem:[#allocation2 + $0x38] sm:$0xf] %v672_v18 }
 0x2b5   : > { %v624_v21 = vpop.permute.xlu0 %623 }
 0x2b6   : > { %v627_v23 = vsel %vm1753_vm1, %v624_v21, %v626_v60  ;;  %v628_v25 = vsel %vm1754_vm7, %v626_v60, %v624_v21  ;;  %vm1768_vm1 = vnez %v1738_v39 }
 0x2b7   : > { %v629_v19 = vsel %vm1439_vm10, %v627_v23, 0.0  ;;  %v630_v26 = vsel %vm1443_vm11, %v628_v25, 0.0  ;;  %v684_v40 = vld [vmem:[#allocation2 + $0x40] sm:$0xf]  ;;  %vm1759_vm10 = vcmp.lt.s32.totalorder %v1392_v24, 1  ;;  %vm1762_vm11 = vcmp.lt.s32.totalorder %v1392_v24, 15 }
 0x2b8   : > { %v633_v27 = vrot.slane %v629_v19, 4  ;;  %v634_v30 = vrot.slane %v630_v26, 4  ;;  %908 = vmatpush.msk.msra.mxu2 %vm1755_vm14, %v684_v40  ;;  %v685_v42 = vld [vmem:[#allocation2 + $0x38] sm:$0xf]  ;;  %vm1763_vm8 = vmmov %vm1762_vm11 }
 0x2b9   : > { %910 = vmatpush.msk.msra.mxu3 %vm1756_vm13, %v685_v42  ;;  %vm1771_vm14 = vmmov %vm1756_vm13 }
 0x2ba   : > { %637 = vst [vmem:[#allocation2 + $0x48] sm:$0xf0] %v633_v27 }
 0x2bb   : > { %638 = vst [vmem:[#allocation2 + $0x28] sm:$0xf0] %v634_v30 }
 0x2bd   : > { %v642_v31 = vpop.permute.xlu0 %641 }
 0x2be   : > { %v643_v32 = vsel %vm1757_vm15, %v640_v61, %v642_v31  ;;  %v644_v58 = vsel %vm1758_vm0, %v642_v31, %v640_v61  ;;  %vm1772_vm15 = vmmov %vm1756_vm13 }
 0x2bf   : > { %v645_v59 = vsel %vm1460_vm5, %v643_v32, 0.0  ;;  %v646_v33 = vsel %vm1464_vm9, %v644_v58, 0.0  ;;  %vm1760_vm5 = vmmov %vm1759_vm10  ;;  %vm1761_vm9 = vnez %v1722_v44  ;;  %v570_v44 = vpop.permute.xlu1 %569 }
 0x2c0   : > { %647 = vst [vmem:[#allocation2 + $0x8] sm:$0xf] %v645_v59  ;;  %vm1773_vm0 = vmmov %vm1756_vm13 }
 0x2c1   : > { %648 = vst [vmem:[#allocation2 + $0x20] sm:$0xf] %v646_v33  ;;  %v680_v22 = vld [vmem:[#allocation2 + $0x48] sm:$0xff] }
 0x2c2   : > { %v681_v41 = vld [vmem:[#allocation2 + $0x28] sm:$0xff] }
 0x2c5   : > { %v606_v34 = vpop.permute.xlu0 %605 }
 0x2c7   : > { %v682_v35 = vld [vmem:[#allocation2 + $0x8] sm:$0xff] }
 0x2c8   : > { %707 = vmatpush.msra.mxu2 %v682_v35  ;;  %v683_v36 = vld [vmem:[#allocation2 + $0x20] sm:$0xff] }
 0x2c9   : > { %727 = vmatpush.msra.mxu3 %v683_v36 }
 0x2ca   : > { %708 = vmatpush.msra.mxu2 %v680_v22 }
 0x2cb   : > { %728 = vmatpush.msra.mxu3 %v681_v41 }
 0x2cd   : > { %v608_v45 = vpop.permute.xlu0 %607 }
 0x2ce   : > { %v609_v46 = vsel %vm1759_vm10, %v606_v34, %v608_v45  ;;  %v610_v4 = vsel %vm1760_vm5, %v608_v45, %v606_v34 }
 0x2cf   : > { %v611_v5 = vsel %vm1416_vm6, %v610_v4, 0.0  ;;  %v612_v47 = vsel %vm1761_vm9, %v609_v46, 0.0  ;;  %vm1764_vm6 = vnez %v1746_v57 }
 0x2d0   : > { %v615_v48 = vrot.slane %v611_v5, 4  ;;  %v616_v49 = vrot.slane %v612_v47, 4 }
 0x2d2   : > { %619 = vst [vmem:[#allocation2 + $0x18] sm:$0xf0] %v615_v48 }
 0x2d3   : > { %620 = vst [vmem:[#allocation2 + $0x10] sm:$0xf0] %v616_v49 }
 0x2d5   : > { %v596_v51 = vpop.permute.xlu0 %595 }
 0x2d6   : > { %v599_v52 = vsel %vm1762_vm11, %v596_v51, %v598_v50  ;;  %v600_v53 = vsel %vm1763_vm8, %v598_v50, %v596_v51  ;;  %vm1774_vm11 = vmmov %vm1773_vm0 }
 0x2d7   : > { %v601_v54 = vsel %vm1540_vm4, %v600_v53, 0.0  ;;  %v602_v43 = vsel %vm1764_vm6, %v599_v52, 0.0  ;;  %vm1769_vm4 = vcmask 293888  }
 0x2d8   : > { %603 = vst [vmem:[#allocation2 + $0x18] sm:$0xf] %v601_v54  ;;  %vm1770_vm7 = vmmov %vm1769_vm4 }
 0x2d9   : > { %604 = vst [vmem:[#allocation2 + $0x10] sm:$0xf] %v602_v43 }
 0x2dd   : > { %v572_v55 = vpop.permute.xlu0 %571 }
 0x2de   : > { %v573_v60 = vsel %vm1765_vm12, %v570_v44, %v572_v55  ;;  %v574_v61 = vsel %vm1766_vm2, %v572_v55, %v570_v44 }
 0x2df   : > { %v575_v62 = vsel %vm1767_vm3, %v574_v61, 0.0  ;;  %v576_v56 = vsel %vm1768_vm1, %v573_v60, 0.0  ;;  %v678_v63 = vld [vmem:[#allocation2 + $0x18] sm:$0xff] }
 0x2e0   : > { %577 = vst [vmem:[#allocation2 + $0x30] sm:$0xf] %v575_v62  ;;  %709 = vmatpush.msra.mxu2 %v678_v63  ;;  %v679_v57 = vld [vmem:[#allocation2 + $0x10] sm:$0xff] }
 0x2e1   : > { %578 = vst [vmem:[#allocation2] sm:$0xf] %v576_v56  ;;  %729 = vmatpush.msra.mxu3 %v679_v57 }
 0x2e7   : > { %v676_v2 = vld [vmem:[#allocation2 + $0x30] sm:$0xff] }
 0x2e8   : > { %710 = vmatpush.msra.mxu2 %v676_v2  ;;  %v677_v3 = vld [vmem:[#allocation2] sm:$0xff] }
 0x2e9   : > { %730 = vmatpush.msra.mxu3 %v677_v3  ;;  %909 = vmatmul.msk.f32.vlgmr.msra.gmra.mxu2 %vm1769_vm4, %v675_v1 }
 0x2ea   : > { %911 = vmatmul.msk.f32.vlgmr.msra.gmra.mxu3 %vm1770_vm7, %v675_v1 }
 0x36c   : > { %v712_v24 = vpop.f32.mrf.mxu2 }
 0x36d   : > { %v735_v37 = vsel %vm1771_vm14, %v712_v24, 0.0  ;;  %v740_v39 = vmul.f32 %v712_v24, %v712_v24  ;;  %v732_v6 = vpop.f32.mrf.mxu3 }
 0x36e   : > { %v736_v7 = vsel %vm1756_vm13, %v732_v6, 0.0  ;;  %v741_v38 = vmul.f32 %v732_v6, %v732_v6 }
 0x36f   : > { %v737_v8 = vadd.f32 %v736_v7, %v735_v37  ;;  %v742_v9 = vsel %vm1772_vm15, %v740_v39, 0.0 }
 0x370   : > { %v743_v10 = vsel %vm1773_vm0, %v741_v38, 0.0 }
 0x371   : > { %738 = vadd.xlane.f32.xlu2 %v737_v8  ;;  %v744_v11 = vadd.f32 %v743_v10, %v742_v9 }
 0x373   : > { %745 = vadd.xlane.f32.xlu1 %v744_v11 }
 0x3e4   : > { %v739_v12 = vpop.xlane.xlu2 %738 }
 0x3e5   : > { %v747_v13 = vmul.f32 0.00390625, %v739_v12 }
 0x3e6   : > { %v746_v14 = vpop.xlane.xlu1 %745 }
 0x3e7   : > { %v748_v28 = vmul.f32 0.00390625, %v746_v14  ;;  %v749_v29 = vmul.f32 %v747_v13, %v747_v13  ;;  %v752_v19 = vsub.f32 %v732_v6, %v747_v13  ;;  %v751_v40 = vsub.f32 %v712_v24, %v747_v13 }
 0x3e9   : > { %v750_v15 = vsub.f32 %v748_v28, %v749_v29 }
 0x3eb   : > { %v753_v16 = vadd.f32 1e-05, %v750_v15 }
 0x3ed   : > { %1007 = vrsqrt.f32 %v753_v16  ;;  %vm760_vm5 = vweird.f32 %v753_v16 }
 0x3f3   : > { %v1008_v20 = vpop.eup %1007 }
 0x3f4   : > { %v755_v17 = vmul.f32 %v1008_v20, %v753_v16  ;;  %vm761_vm10 = vweird.f32 %v1008_v20 }
 0x3f5   : > { %vm762_vm9 = vmor %vm760_vm5, %vm761_vm10 }
 0x3f6   : > { %v756_v18 = vmul.f32 %v1008_v20, %v755_v17 }
 0x3f8   : > { %v757_v21 = vmul.f32 0.5, %v756_v18 }
 0x3fa   : > { %v758_v23 = vsub.f32 1.5, %v757_v21 }
 0x3fc   : > { %v759_v25 = vmul.f32 %v1008_v20, %v758_v23 }
 0x3fe   : > { %v763_v26 = vsel %vm762_vm9, %v1008_v20, %v759_v25 }
 0x3ff   : > { %v765_v27 = vmul.f32 %v763_v26, %v752_v19  ;;  %v764_v30 = vmul.f32 %v763_v26, %v751_v40 }
 0x401   : > { %v768_v42 = vrot.slane %v765_v27, 4 }
 0x403   : > { %v769_v31 = vsel %vm1774_vm11, %v764_v30, %v768_v42 }
 0x404   : > { %v771_v32 = vadd.f32 %v769_v31, %v1359_v0 }
 0x406   : > { %772 = vst [vmem:[%s259_s29] sm:$0xff] %v771_v32 }
 0x407   : > { %1156 = shalt.err (!%p1153_p11)
}
 0x408   : > { %933 = dma.vmem_to_hbm [thread:$0]  (%p1314_p3), %s788_s5, 128, %s790_s7, %s774_s19  }
 0x409 PF: > { %s801_s25 = sand.u32 1, %s1191_s15   ;;  %p1775_p12 = scmp.ge.s32.totalorder %s1203_s18, 2 }
 0x40a   : > { %s802_s11 = scalar_lea.sflag [#allocation5], %s801_s25 }
 0x40b   : > { %p950_p13 = pnand %p1775_p12, %p1277_p6 }
 0x40d   : > { %p951_p0 = pneg %p950_p13 }
 0x40f   : > { %1186 = dma.done.wait (%p951_p0), %s802_s11, 128  }
 0x410   : > { %1188 = vsyncadd (%p951_p0), %s802_s11, 4294967168  ;;  %p19_p5 = scmp.ge.s32.totalorder %s1301_s13, 4   ;;  %s1776_s15 = smov %s1195_s16 }
 0x411   : > { %s1777_s16 = smov %s1199_s17  ;;  %s1778_s17 = smov %s1310_s23 }
 0x412   : > { %s1779_s18 = smov %s1301_s13  ;;  %21 = sbr.rel (!%p19_p5) target bundleno = 7 (0x7), region = 94 }
 0x417   :  { %808 = vsyncpa [#allocation4], 1 }
 0x418   :  { %810 = vsyncpa [#allocation4 + $0x1], 1 }
 0x419   :  { %811 = vsyncpa [#allocation7], 1 }
 0x41a   :  { %812 = vsyncpa [#allocation10], 1 }
 0x41b   :  { %813 = vsyncpa [#allocation5], 1 }
 0x41c   :  { %815 = vsyncpa [#allocation5 + $0x1], 1 }

</bundles_post_ra>
